<compile_context>
chip_gen: v5e
topology: v5e:2x2
jax: 0.10.0
libtpu: 0.0.40
codegen_flags: <defaults>
</compile_context>

<pallas_src>
import functools

import jax
import jax.numpy as jnp
from jax.experimental import pallas as pl
from jax.experimental.pallas import tpu as pltpu


def _ce_loss_kernel(logits_ref, labels_ref, loss_ref, *, total_b, tb):
    """One batch tile of numerically stable softmax cross-entropy.

    logits_ref: (TB, C) native-dtype VMEM block of logits
    labels_ref: (TB, 1) int32 VMEM block of class ids
    loss_ref:   (1, 1)  f32 SMEM accumulator / output (resident across grid)
    """
    i = pl.program_id(0)

    @pl.when(i == 0)
    def _init():
        loss_ref[0, 0] = jnp.float32(0.0)

    # In-kernel cast: DMA stays in the native dtype (bf16-friendly).
    x = logits_ref[...].astype(jnp.float32)          # (TB, C)
    lab = labels_ref[...]                            # (TB, 1) int32

    # log-sum-exp along the class (lane) axis, max-shifted for stability.
    m = jnp.max(x, axis=-1, keepdims=True)           # (TB, 1)
    z = x - m                                        # (TB, C)
    lse = jnp.log(jnp.sum(jnp.exp(z), axis=-1, keepdims=True))  # (TB, 1)

    # Picked logit via iota == label mask (replaces the one-hot multiply).
    col = jax.lax.broadcasted_iota(jnp.int32, x.shape, 1)        # (TB, C)
    picked = jnp.sum(jnp.where(col == lab, x, 0.0),
                     axis=-1, keepdims=True)                     # (TB, 1)

    # per-row CE = lse + m - x[label]
    per_row = lse + m - picked                                   # (TB, 1)

    # Mask rows of a padded last tile out of the reduction.
    row = i * tb + jax.lax.broadcasted_iota(jnp.int32, (tb, 1), 0)
    per_row = jnp.where(row < total_b, per_row, 0.0)

    loss_ref[0, 0] += jnp.sum(per_row)

    @pl.when(i == pl.num_programs(0) - 1)
    def _finalize():
        loss_ref[0, 0] = loss_ref[0, 0] * jnp.float32(1.0 / total_b)


def _choose_batch_tile(batch, num_classes, itemsize):
    """Pick TB so one logits block is <= ~4 MiB (double-buffered ~8 MiB),
    which fits the scoped-VMEM defaults on v5e (16 MiB) / v6e (32 MiB) /
    v7x (32 MiB)."""
    target_bytes = 4 * 1024 * 1024
    tb = target_bytes // max(1, num_classes * itemsize)
    tb = int(max(8, min(tb, batch)))
    if tb >= batch:
        return batch                      # full batch: any size is legal
    return max(8, (tb // 8) * 8)          # sublane (8) alignment for tiling


def _cross_entropy_pallas(logits, label_ids):
    B, C = logits.shape
    itemsize = jnp.dtype(logits.dtype).itemsize
    labels2d = label_ids.astype(jnp.int32).reshape(B, 1)

    tb = _choose_batch_tile(B, C, itemsize)
    grid = (pl.cdiv(B, tb),)

    kernel = functools.partial(_ce_loss_kernel, total_b=B, tb=tb)

    out = pl.pallas_call(
        kernel,
        out_shape=jax.ShapeDtypeStruct((1, 1), jnp.float32),
        grid_spec=pltpu.PrefetchScalarGridSpec(
            num_scalar_prefetch=0,
            grid=grid,
            in_specs=[
                pl.BlockSpec((tb, C), lambda i: (i, 0)),   # logits tile
                pl.BlockSpec((tb, 1), lambda i: (i, 0)),   # int32 label ids
            ],
            out_specs=pl.BlockSpec(memory_space=pltpu.MemorySpace.SMEM),
        ),
        compiler_params=pltpu.CompilerParams(
            dimension_semantics=("arbitrary",),            # scalar reduction
            vmem_limit_bytes=32 * 1024 * 1024,
        ),
        cost_estimate=pl.CostEstimate(
            flops=int(5 * B * C),
            transcendentals=int(B * C),
            bytes_accessed=int(B * C * itemsize + B * 4 + 4),
        ),
    )(logits, labels2d)
    return out[0, 0]


class BaseClassificationLoss:
    """JAX/Pallas mirror of the PyTorch BaseClassificationLoss module."""

    def __init__(self):
        # matches PyTorch __init__: only a losses dict, no parameters
        self.losses = {}

    def forward(self, logits, code_logits, labels, onehot=True):
        # Reduce labels to int32 class ids outside the kernel so the kernel
        # only streams B ints instead of a BxC one-hot float array.
        # TODO(synk): argmax assumes hard (one-hot) labels; true soft labels
        # would need the dense-label kernel variant.
        if onehot:
            label_ids = jnp.argmax(labels, axis=-1).astype(jnp.int32)
        else:
            label_ids = labels.astype(jnp.int32)
        # code_logits is unused by the base loss (signature parity only).
        loss = _cross_entropy_pallas(logits, label_ids)
        self.losses["ce"] = loss
        return loss

    def __call__(self, *args, **kwargs):
        return self.forward(*args, **kwargs)


if __name__ == "__main__":
    key = jax.random.PRNGKey(0)
    k1, k2, k3 = jax.random.split(key, 3)

    B, C, K = 8, 32, 32  # batch, num_classes, code/hash bits
    logits = jax.random.normal(k1, (B, C), dtype=jnp.float32)
    code_logits = jax.random.normal(k2, (B, K), dtype=jnp.float32)
    label_ids = jax.random.randint(k3, (B,), 0, C)
    labels_onehot = jax.nn.one_hot(label_ids, C, dtype=jnp.float32)

    loss_mod = BaseClassificationLoss()
    loss = loss_mod(logits, code_logits, labels_onehot, onehot=True)
    loss = jax.block_until_ready(loss)

    # sanity check against a pure-JAX reference
    ref = jnp.mean(
        -jnp.sum(labels_onehot * jax.nn.log_softmax(logits, axis=-1), axis=-1)
    )
    assert jnp.allclose(loss, ref, atol=1e-5, rtol=1e-5), (loss, ref)

    # also check the integer-label path
    loss2 = loss_mod(logits, code_logits, label_ids, onehot=False)
    loss2 = jax.block_until_ready(loss2)
    assert jnp.allclose(loss2, ref, atol=1e-5, rtol=1e-5), (loss2, ref)

    print("KERNEL_OK")
</pallas_src>

<mosaic_0001>
module attributes {stable_mosaic.version = 11 : i64} {
  func.func @_ce_loss_kernel(%arg0: i32, %arg1: memref<8x32xf32, #tpu.memory_space<vmem>>, %arg2: memref<8x1xi32, #tpu.memory_space<vmem>>, %arg3: memref<1x1xf32, #tpu.memory_space<smem>>) attributes {dimension_semantics = [#tpu.dimension_semantics<arbitrary>], iteration_bounds = array<i64: 1>, scalar_prefetch = 0 : i64, scratch_operands = 0 : i64, tpu.core_type = #tpu.core_type<tc>, window_params = [{transform_indices = @transform_0, window_bounds = array<i64: 8, 32>}, {transform_indices = @transform_1, window_bounds = array<i64: 8, 1>}, {transform_indices = @transform_2, window_bounds = array<i64: 1, 1>}]} {
    %c0_i32 = arith.constant 0 : i32
    %0 = arith.cmpi eq, %arg0, %c0_i32 : i32
    %1 = arith.extui %0 : i1 to i32
    %c0_i32_0 = arith.constant 0 : i32
    %2 = arith.cmpi ne, %1, %c0_i32_0 : i32
    scf.if %2 {
      %cst_16 = arith.constant 0.000000e+00 : f32
      %c0_17 = arith.constant 0 : index
      %c0_18 = arith.constant 0 : index
      %40 = memref.load %arg3[%c0_17, %c0_18] : memref<1x1xf32, #tpu.memory_space<smem>>
      memref.store %cst_16, %arg3[%c0_17, %c0_18] : memref<1x1xf32, #tpu.memory_space<smem>>
    } else {
    }
    %c0 = arith.constant 0 : index
    %c0_1 = arith.constant 0 : index
    %3 = vector.load %arg1[%c0, %c0_1] : memref<8x32xf32, #tpu.memory_space<vmem>>, vector<8x32xf32>
    %c0_2 = arith.constant 0 : index
    %c0_3 = arith.constant 0 : index
    %4 = vector.load %arg2[%c0_2, %c0_3] : memref<8x1xi32, #tpu.memory_space<vmem>>, vector<8x1xi32>
    %cst = arith.constant dense<0xFF800000> : vector<8xf32>
    %5 = vector.multi_reduction <maximumf>, %3, %cst [1] : vector<8x32xf32> to vector<8xf32>
    %6 = vector.shape_cast %5 : vector<8xf32> to vector<8x1xf32>
    %7 = vector.broadcast %6 : vector<8x1xf32> to vector<8x32xf32>
    %8 = arith.subf %3, %7 : vector<8x32xf32>
    %9 = math.exp %8 : vector<8x32xf32>
    %cst_4 = arith.constant dense<0.000000e+00> : vector<8xf32>
    %10 = vector.multi_reduction <add>, %9, %cst_4 [1] : vector<8x32xf32> to vector<8xf32>
    %11 = vector.shape_cast %10 : vector<8xf32> to vector<8x1xf32>
    %12 = math.log %11 : vector<8x1xf32>
    %13 = tpu.iota {dimensions = array<i32: 1>} : vector<8x32xi32>
    %14 = vector.broadcast %4 : vector<8x1xi32> to vector<8x32xi32>
    %15 = arith.cmpi eq, %13, %14 : vector<8x32xi32>
    %cst_5 = arith.constant 0.000000e+00 : f32
    %16 = vector.broadcast %cst_5 : f32 to vector<8x32xf32>
    %17 = arith.select %15, %3, %16 : vector<8x32xi1>, vector<8x32xf32>
    %cst_6 = arith.constant dense<0.000000e+00> : vector<8xf32>
    %18 = vector.multi_reduction <add>, %17, %cst_6 [1] : vector<8x32xf32> to vector<8xf32>
    %19 = vector.shape_cast %18 : vector<8xf32> to vector<8x1xf32>
    %20 = arith.addf %12, %6 : vector<8x1xf32>
    %21 = arith.subf %20, %19 : vector<8x1xf32>
    %c8_i32 = arith.constant 8 : i32
    %22 = arith.muli %arg0, %c8_i32 : i32
    %23 = tpu.iota {dimensions = array<i32: 0>} : vector<8x1xi32>
    %24 = vector.broadcast %22 : i32 to vector<8x1xi32>
    %25 = arith.addi %24, %23 : vector<8x1xi32>
    %c8_i32_7 = arith.constant 8 : i32
    %26 = vector.broadcast %c8_i32_7 : i32 to vector<8x1xi32>
    %27 = arith.cmpi slt, %25, %26 : vector<8x1xi32>
    %cst_8 = arith.constant 0.000000e+00 : f32
    %28 = vector.broadcast %cst_8 : f32 to vector<8x1xf32>
    %29 = arith.select %27, %21, %28 : vector<8x1xi1>, vector<8x1xf32>
    %c0_9 = arith.constant 0 : index
    %c0_10 = arith.constant 0 : index
    %30 = memref.load %arg3[%c0_9, %c0_10] : memref<1x1xf32, #tpu.memory_space<smem>>
    %31 = vector.shape_cast %29 : vector<8x1xf32> to vector<1x8x1xf32>
    %cst_11 = arith.constant dense<0.000000e+00> : vector<1xf32>
    %32 = vector.multi_reduction <add>, %31, %cst_11 [1, 2] : vector<1x8x1xf32> to vector<1xf32>
    %33 = vector.shape_cast %32 : vector<1xf32> to vector<1x1x1xf32>
    %34 = vector.extract %33[0, 0, 0] : f32 from vector<1x1x1xf32>
    %35 = arith.addf %30, %34 : f32
    %c0_12 = arith.constant 0 : index
    %c0_13 = arith.constant 0 : index
    %36 = memref.load %arg3[%c0_12, %c0_13] : memref<1x1xf32, #tpu.memory_space<smem>>
    memref.store %35, %arg3[%c0_12, %c0_13] : memref<1x1xf32, #tpu.memory_space<smem>>
    %c0_i32_14 = arith.constant 0 : i32
    %37 = arith.cmpi eq, %arg0, %c0_i32_14 : i32
    %38 = arith.extui %37 : i1 to i32
    %c0_i32_15 = arith.constant 0 : i32
    %39 = arith.cmpi ne, %38, %c0_i32_15 : i32
    scf.if %39 {
      %c0_16 = arith.constant 0 : index
      %c0_17 = arith.constant 0 : index
      %40 = memref.load %arg3[%c0_16, %c0_17] : memref<1x1xf32, #tpu.memory_space<smem>>
      %cst_18 = arith.constant 1.250000e-01 : f32
      %41 = arith.mulf %40, %cst_18 : f32
      %c0_19 = arith.constant 0 : index
      %c0_20 = arith.constant 0 : index
      %42 = memref.load %arg3[%c0_19, %c0_20] : memref<1x1xf32, #tpu.memory_space<smem>>
      memref.store %41, %arg3[%c0_19, %c0_20] : memref<1x1xf32, #tpu.memory_space<smem>>
    } else {
    }
    return
  }
  func.func @transform_0(%arg0: i32) -> (i32, i32) {
    %c0_i32 = arith.constant 0 : i32
    %c0_i32_0 = arith.constant 0 : i32
    return %arg0, %c0_i32 : i32, i32
  }
  func.func @transform_1(%arg0: i32) -> (i32, i32) {
    %c0_i32 = arith.constant 0 : i32
    %c0_i32_0 = arith.constant 0 : i32
    return %arg0, %c0_i32 : i32, i32
  }
  func.func @transform_2(%arg0: i32) -> (i32, i32) {
    %c0_i32 = arith.constant 0 : i32
    %c0_i32_0 = arith.constant 0 : i32
    %c0_i32_1 = arith.constant 0 : i32
    return %c0_i32, %c0_i32_0 : i32, i32
  }
}

</mosaic_0001>

<bundles_post_ra>
// kernel: tpu_custom_call.1
= control target key start
LH: loop header
LB: loop body
LE: loop exit
PB: predicated region body
PF: predicated region fallthrough
CT: control target
= control target key end

     0   :  { %vm20_vm0 = vcmask 261120   ;;  %s140_s0 = inlined_call_operand.vmem [shape: f32[8,32], index: 0, kind: input, shape index: {}]   ;;  %s141_s1 = inlined_call_operand.vmem [shape: s32[8,1], index: 1, kind: input, shape index: {}]   ;;  %s142_s2 = inlined_call_operand.hbm [shape: f32[1,1], index: 2, kind: output, shape index: {}]  }
   0x1   :  { %v18_v0 = vld [vmem:[%s140_s0] sm:$0xff] }
   0x2   :  { %7 = vsyncpa [#allocation3], 0  ;;  %v21_v1 = vsel %vm20_vm0, %v18_v0, -inf  ;;  %v111_v2 = vmov 0   ;;  %v19_v3 = vld [vmem:[%s141_s1] sm:$0xff]  ;;  %v32_v9 = vlaneseq  ;;  %vm52_vm2 = vcmask 7168  }
   0x3   :  { %92 = vset.pattern.permute.xlu0 %v111_v2  ;;  %s77_s13 = sshll.u32 %s142_s2, 4  ;;  %s112_s16 = smov [#allocation2]   ;;  %s78_s13 = int_to_ptr.hbm [resolvable:$true] %s77_s13 }
   0x4   :  { %22 = vmax.xlane.f32.xlu0 %v21_v1  ;;  %v33_v10 = vand.u32 127, %v32_v9 }
  0x18   :  { %35 = vperm.xlu0 %92, %v19_v3  }
  0x77   :  { %v23_v4 = vpop.xlane.xlu0 %22 }
  0x78   :  { %v24_v5 = vsub.f32 %v18_v0, %v23_v4 }
  0x7a   :  { %v25_v6 = vmul.f32 1.442695, %v24_v5 }
  0x7c   :  { %93 = vpow2.f32 %v25_v6 }
  0x82   :  { %v94_v7 = vpop.eup %93 }
  0x83   :  { %v27_v8 = vsel %vm20_vm0, %v94_v7, 0.0 }
  0x84   :  { %28 = vadd.xlane.f32.xlu1 %v27_v8 }
  0x8a   :  { %v36_v11 = vpop.permute.xlu0 %35 }
  0x8b   :  { %vm37_vm1 = vcmp.eq.s32.totalorder %v33_v10, %v36_v11 }
  0x8c   :  { %v38_v12 = vsel %vm37_vm1, %v18_v0, 0.0 }
  0x8d   :  { %v39_v13 = vsel %vm20_vm0, %v38_v12, 0.0 }
  0x8e   :  { %40 = vadd.xlane.f32.xlu1 %v39_v13 }
  0xf7   :  { %v29_v14 = vpop.xlane.xlu1 %28 }
  0xf8   :  { %95 = vlog2.f32 %v29_v14 }
  0xfe   :  { %v96_v15 = vpop.eup %95 }
  0xff   :  { %v31_v16 = vmul.f32 0.6931472, %v96_v15 }
 0x101   :  { %v42_v17 = vadd.f32 %v31_v16, %v23_v4  ;;  %v41_v18 = vpop.xlane.xlu1 %40 }
 0x103   :  { %v43_v19 = vsub.f32 %v42_v17, %v41_v18 }
 0x105   :  { %v53_v20 = vsel %vm52_vm2, %v43_v19, 0.0 }
 0x106   :  { %54 = vadd.xlane.f32.xlu2 %v53_v20 }
 0x179   :  { %v55_v21 = vpop.xlane.xlu2 %54 }
 0x17a   :  { %v56_v22 = vrot.slane %v55_v21, 4 }
 0x17c   :  { %v57_v23 = vadd.f32 %v56_v22, %v55_v21 }
 0x17e   :  { %v58_v24 = vrot.slane %v57_v23, 2 }
 0x180   :  { %v59_v25 = vadd.f32 %v58_v24, %v57_v23 }
 0x182   :  { %v60_v26 = vrot.slane %v59_v25, 1 }
 0x184   :  { %v61_v27 = vadd.f32 %v60_v26, %v59_v25 }
 0x186   :  { %87 = vpush %v61_v27 }
 0x1b7   :  { %s88_s14 = spop %87 }
 0x1b8   :  { %s70_s15 = smul.f32 0.125, %s88_s14 }
 0x1ba   :  { %71 = sst [smem:[#allocation2]] %s70_s15 }
 0x1bb   :  { %80 = dma.smem_to_hbm %s112_s16, 16, %s78_s13, [#allocation3]  }
 0x1bc   :  { %109 = dma.done.wait [#allocation3], 16  }
 0x1bd   :  { %110 = vsyncadd [#allocation3], 4294967280 }
 0x1be   :  { %85 = sfence }
 0x1bf   :  { %86 = vsyncpa [#allocation3], 1 }

</bundles_post_ra>
